<compile_context>
chip_gen: v7x
topology: tpu7x:2x2x1
jax: 0.10.0
libtpu: 0.0.40
codegen_flags: <defaults>
</compile_context>

<pallas_src>
import functools
import random as pyrandom

import numpy as np
import jax
import jax.numpy as jnp
from jax.experimental import pallas as pl
from jax.experimental.pallas import tpu as pltpu

NEG_BIG = -9000000000000000.0   # the -9e15 fill value used by the reference
LANE = 128


def _pad_to(x, m):
    return ((x + m - 1) // m) * m


@functools.lru_cache(maxsize=None)
def _vmem_limit_bytes():
    # ~3/4 of physical VMEM, capped at 96 MiB:
    #   v5e/v6e (128 MiB parts) -> 96 MiB, v7x (64 MiB parts) -> 48 MiB.
    try:
        cap = int(pltpu.get_tpu_info().vmem_capacity_bytes)
    except Exception:
        cap = 64 * 1024 * 1024
    return int(min(cap * 3 // 4, 96 * 1024 * 1024))


def _pick_tile(dim, prefs):
    for p in prefs:
        if p <= dim and dim % p == 0:
            return p
    return dim


def _pick_tm(dim, prefs=(512, 256, 128, 64, 32, 16, 8)):
    # Prefer a tile giving >= 2 grid steps along the parallel axis so both v7x
    # TensorCores are used; otherwise fall back to the full extent.
    for p in prefs:
        if dim % p == 0 and dim // p >= 2:
            return p
    return dim


# ----------------------------- Pallas kernels -----------------------------

def _proj_kernel(x_ref, w_ref, h_ref, f1_ref, f2_ref, acc_ref, *, hdp):
    """Fused projection Y = X @ W_aug accumulated over K tiles.
    W_aug column groups:
      [0, hdp)            packed per-head h = X @ W   (d lanes per head, bf16 out)
      [hdp, hdp+128)      folded f1: lane h = X @ (W_h @ a1_h)   (f32 out)
      [hdp+128, hdp+256)  folded f2: lane h = X @ (W_h @ a2_h)   (f32 out)"""
    k = pl.program_id(1)

    @pl.when(k == 0)
    def _():
        acc_ref[...] = jnp.zeros_like(acc_ref)

    acc_ref[...] += jnp.dot(x_ref[...], w_ref[...],
                            preferred_element_type=jnp.float32)

    @pl.when(k == pl.num_programs(1) - 1)
    def _():
        acc = acc_ref[...]
        h_ref[...] = acc[:, :hdp].astype(h_ref.dtype)
        f1_ref[...] = acc[:, hdp:hdp + LANE]
        f2_ref[...] = acc[:, hdp + LANE:]


def _att_kernel(cnt_ref, nmap_ref, rowf1_ref, f2_ref, h_ref, mask_ref, o_ref,
                m_sc, l_sc, acc_sc, *, nheads, d, hdp, alpha, n_blocks):
    """Fused multi-head masked attention, online softmax over the neighbor axis.
    grid = (T/tm, N/tn); N is the reduction ('arbitrary', last).  Fully-masked
    (t, n) tiles are skipped via the scalar-prefetched occupancy count."""
    t = pl.program_id(0)
    n = pl.program_id(1)

    @pl.when(n == 0)
    def _init():
        m_sc[...] = jnp.full(m_sc.shape, -1e30, dtype=jnp.float32)
        l_sc[...] = jnp.zeros(l_sc.shape, dtype=jnp.float32)
        acc_sc[...] = jnp.zeros(acc_sc.shape, dtype=jnp.float32)

    @pl.when(cnt_ref[t * n_blocks + n] > 0)
    def _compute():
        h_tile = h_ref[...]                              # (tn, hdp) bf16, packed heads
        rowf1 = rowf1_ref[...]                           # (tm, 128) f32, lane h = head h
        f2_all = f2_ref[...]                             # (nh8, tn) f32, row h = head h
        edge = mask_ref[...] > 0                         # (tm, tn) bool, direct i8 compare
        alpha_f = jnp.float32(alpha)
        for h in range(nheads):
            f1_h = rowf1[:, h:h + 1]                     # (tm, 1)
            f2_h = f2_all[h:h + 1, :]                    # (1, tn)
            e = f1_h + f2_h                              # (tm, tn)
            # fused LeakyReLU(alpha) + mask-fill (scatter expressed as mask-fill)
            logits = jnp.where(edge, jnp.where(e > 0, e, alpha_f * e),
                               jnp.float32(NEG_BIG))
            m_prev = m_sc[h]                             # (tm, 1)
            m_new = jnp.maximum(m_prev, jnp.max(logits, axis=1, keepdims=True))
            corr = jnp.exp(m_prev - m_new)
            p = jnp.exp(logits - m_new)                  # (tm, tn)
            l_sc[h] = corr * l_sc[h] + jnp.sum(p, axis=1, keepdims=True)
            # pv against the packed h tile; only this head's d lanes are kept at
            # finalize time (single MXU pass regardless since hdp <= 256).
            pv = jnp.dot(p.astype(h_tile.dtype), h_tile,
                         preferred_element_type=jnp.float32)   # (tm, hdp)
            acc_sc[h] = corr * acc_sc[h] + pv
            m_sc[h] = m_new

    @pl.when(n == pl.num_programs(1) - 1)
    def _finalize():
        lane = jax.lax.broadcasted_iota(jnp.int32, (1, hdp), 1)
        res = jnp.zeros(o_ref.shape, dtype=jnp.float32)
        for h in range(nheads):
            l_h = l_sc[h]
            # rows whose every tile was skipped (pure padding) get exact 0, never NaN
            inv_l = jnp.where(l_h > 0.0, pl.reciprocal(l_h, approx=True), 0.0)
            hp = acc_sc[h] * inv_l                       # (tm, hdp)
            # ELU (alpha=1); exp argument clamped so it never overflows
            elu = jnp.where(hp > 0, hp, jnp.exp(jnp.minimum(hp, 0.0)) - 1.0)
            in_head = (lane >= h * d) & (lane < (h + 1) * d)
            res = jnp.where(in_head, elu, res)
        o_ref[...] = res.astype(o_ref.dtype)             # single lane-dense store


def _linear_tanh_kernel(x_ref, w_ref, b_ref, o_ref):
    y = jnp.dot(x_ref[...], w_ref[...], preferred_element_type=jnp.float32)
    o_ref[...] = jnp.tanh(y + b_ref[...]).astype(o_ref.dtype)


# ----------------------------- kernel wrappers -----------------------------

def project(x, w_aug, hdp):
    n_pad, in_pad = x.shape
    c_out = w_aug.shape[1]
    tm = _pick_tm(n_pad)
    tk = _pick_tile(in_pad, (1024, 512, 256, 128))
    grid = (n_pad // tm, in_pad // tk)
    return pl.pallas_call(
        functools.partial(_proj_kernel, hdp=hdp),
        out_shape=(jax.ShapeDtypeStruct((n_pad, hdp), jnp.bfloat16),
                   jax.ShapeDtypeStruct((n_pad, LANE), jnp.float32),
                   jax.ShapeDtypeStruct((n_pad, LANE), jnp.float32)),
        grid_spec=pltpu.PrefetchScalarGridSpec(
            num_scalar_prefetch=0,
            grid=grid,
            in_specs=[pl.BlockSpec((tm, tk), lambda m, k: (m, k)),
                      # W block index independent of m -> revisit detection keeps the
                      # weight slab resident when it fits in a single K tile.
                      pl.BlockSpec((tk, c_out), lambda m, k: (k, 0))],
            out_specs=[pl.BlockSpec((tm, hdp), lambda m, k: (m, 0)),
                       pl.BlockSpec((tm, LANE), lambda m, k: (m, 0)),
                       pl.BlockSpec((tm, LANE), lambda m, k: (m, 0))],
            scratch_shapes=[pltpu.VMEM((tm, c_out), jnp.float32)]),
        compiler_params=pltpu.CompilerParams(
            dimension_semantics=("parallel", "arbitrary"),
            vmem_limit_bytes=_vmem_limit_bytes()),
    )(x, w_aug)


def homo_att_layer(rowf1, f2t, h, mask_np, nheads, d, hdp, alpha):
    t_pad = rowf1.shape[0]
    n_pad = h.shape[0]
    nh8 = f2t.shape[0]
    tm = _pick_tm(t_pad)
    tn = _pick_tile(n_pad, (1024, 512, 256, 128))
    tmb, tnb = t_pad // tm, n_pad // tn

    # per-(t_block, n_block) edge occupancy: fully-masked tiles are skipped in-kernel
    cnt = (mask_np.astype(np.int32)
           .reshape(tmb, tm, tnb, tn).sum(axis=(1, 3)).astype(np.int32))
    # remapped n-block index: empty tiles repeat the previous non-empty block index so
    # the pipeline's revisit detection skips their h / mask DMAs entirely.
    nmap = np.zeros((tmb, tnb), np.int32)
    for tb in range(tmb):
        nz = np.nonzero(cnt[tb])[0]
        last = int(nz[0]) if len(nz) else 0
        for nb in range(tnb):
            if cnt[tb, nb] > 0:
                last = nb
            nmap[tb, nb] = last

    kern = functools.partial(_att_kernel, nheads=nheads, d=d, hdp=hdp,
                             alpha=float(alpha), n_blocks=tnb)
    return pl.pallas_call(
        kern,
        out_shape=jax.ShapeDtypeStruct((t_pad, hdp), jnp.bfloat16),
        grid_spec=pltpu.PrefetchScalarGridSpec(
            num_scalar_prefetch=2,
            grid=(tmb, tnb),
            in_specs=[
                pl.BlockSpec((tm, LANE), lambda t, n, c, r: (t, 0)),            # rowf1
                pl.BlockSpec((nh8, tn), lambda t, n, c, r: (0, r[t * tnb + n])),  # f2^T
                pl.BlockSpec((tn, hdp), lambda t, n, c, r: (r[t * tnb + n], 0)),  # h
                pl.BlockSpec((tm, tn), lambda t, n, c, r: (t, r[t * tnb + n])),   # mask
            ],
            out_specs=pl.BlockSpec((tm, hdp), lambda t, n, c, r: (t, 0)),
            scratch_shapes=[pltpu.VMEM((nheads, tm, 1), jnp.float32),   # running max
                            pltpu.VMEM((nheads, tm, 1), jnp.float32),   # running sum
                            pltpu.VMEM((nheads, tm, hdp), jnp.float32)]),  # acc
        compiler_params=pltpu.CompilerParams(
            dimension_semantics=("parallel", "arbitrary"),
            vmem_limit_bytes=_vmem_limit_bytes()),
    )(jnp.asarray(cnt.reshape(-1)), jnp.asarray(nmap.reshape(-1)),
      rowf1, f2t, h, jnp.asarray(mask_np))


def linear_tanh(x, w, b):
    t_pad, k = x.shape
    lp = w.shape[1]
    tm = _pick_tm(t_pad)
    grid = (t_pad // tm,)
    # TODO(synk): for very large final layers fuse this into the last attention
    # kernel's epilogue instead of a separate pallas_call.
    return pl.pallas_call(
        _linear_tanh_kernel,
        out_shape=jax.ShapeDtypeStruct((t_pad, lp), jnp.float32),
        grid_spec=pltpu.PrefetchScalarGridSpec(
            num_scalar_prefetch=0,
            grid=grid,
            in_specs=[pl.BlockSpec((tm, k), lambda t: (t, 0)),
                      pl.BlockSpec((k, lp), lambda t: (0, 0)),
                      pl.BlockSpec((1, lp), lambda t: (0, 0))],
            out_specs=pl.BlockSpec((tm, lp), lambda t: (t, 0))),
        compiler_params=pltpu.CompilerParams(
            dimension_semantics=("parallel",),
            vmem_limit_bytes=_vmem_limit_bytes()),
    )(x, w, b)


# ----------------------------- model (host glue) -----------------------------

def xavier_uniform(key, shape, gain):
    fan_out, fan_in = shape[0], shape[1]   # PyTorch convention for 2-D tensors
    bound = gain * np.sqrt(6.0 / (fan_in + fan_out))
    return jax.random.uniform(key, shape, jnp.float32, -bound, bound)


class HomoAttModelPallas:
    def __init__(self, key, in_dim, out_dim, dropout, alpha, nheads, nlayer, neigh_por):
        self.in_dim, self.out_dim = in_dim, out_dim
        self.alpha, self.dropout = alpha, dropout
        # TODO(synk): dropout (training mode) has no in-kernel equivalent here; the
        # forward is the eval-mode path (F.dropout == identity).
        self.nheads, self.nlayer, self.neigh_por = nheads, nlayer, neigh_por

        self.d = out_dim
        self.in0_pad = _pad_to(in_dim, LANE)
        # packed multi-head width: heads contiguous (d lanes each), padded once per layer
        self.hdp = [_pad_to(nheads[i] * out_dim, LANE) for i in range(nlayer)]

        # packed per-layer weights: W_aug = [packed W | folded f1 cols | folded f2 cols]
        self.w_aug = []
        for i in range(nlayer):
            curr_in = in_dim if i == 0 else out_dim * nheads[i - 1]
            in_pad = self.in0_pad if i == 0 else self.hdp[i - 1]
            nh, hdp = nheads[i], self.hdp[i]
            w_aug = np.zeros((in_pad, hdp + 2 * LANE), np.float32)
            for h in range(nh):
                key, k1, k2 = jax.random.split(key, 3)
                W = np.asarray(xavier_uniform(k1, (curr_in, out_dim), 1.414))
                a = np.asarray(xavier_uniform(k2, (2 * out_dim, 1), 1.414))
                a1, a2 = a[:out_dim, 0], a[out_dim:, 0]
                # packed layout of the previous layer is contiguous -> identity row map
                w_aug[:curr_in, h * out_dim:(h + 1) * out_dim] = W
                w_aug[:curr_in, hdp + h] = W @ a1            # f1 column: X @ (W @ a1)
                w_aug[:curr_in, hdp + LANE + h] = W @ a2     # f2 column: X @ (W @ a2)
            self.w_aug.append(jnp.asarray(w_aug, jnp.bfloat16))

        # final Linear(lin_dim, lin_dim) + Tanh; packed layout is already contiguous
        self.lin_dim = out_dim * nheads[-1]
        self.lp = _pad_to(self.lin_dim, LANE)
        key, kw, kb = jax.random.split(key, 3)
        bound = 1.0 / np.sqrt(self.lin_dim)                  # nn.Linear default init
        lw = np.asarray(jax.random.uniform(kw, (self.lin_dim, self.lin_dim),
                                           jnp.float32, -bound, bound))
        lb = np.asarray(jax.random.uniform(kb, (self.lin_dim,),
                                           jnp.float32, -bound, bound))
        w_lin = np.zeros((self.hdp[-1], self.lp), np.float32)
        w_lin[:self.lin_dim, :self.lin_dim] = lw
        b_lin = np.zeros((1, self.lp), np.float32)
        b_lin[0, :self.lin_dim] = lb
        self.lin_w = jnp.asarray(w_lin, jnp.bfloat16)
        self.lin_b = jnp.asarray(b_lin, jnp.float32)

    # host-side neighborhood sampling (mirrors HomoAttModel.sample)
    def sample(self, adj, samples, rng):
        neigh, counts = np.asarray(adj[0]), np.asarray(adj[1])
        sample_list = [np.asarray(samples, dtype=np.int64)]
        adj_list = []
        for _ in range(self.nlayer):
            new_samples = set(int(s) for s in sample_list[-1])
            new_adjs = []
            for s in sample_list[-1]:
                s = int(s)
                neighbor_size = int(counts[s])
                nneighbor = int(self.neigh_por * neighbor_size) + 1
                start = int(counts[:s].sum())
                cand = [int(v) for v in neigh[start:start + neighbor_size]]
                curr_new = cand if neighbor_size <= nneighbor else rng.sample(cand, nneighbor)
                new_samples |= set(curr_new)
                curr_adjs = [[s, t] for t in curr_new]
                curr_adjs.append([s, s])
                new_adjs.extend(curr_adjs)
            sample_list.append(np.array(sorted(new_samples), dtype=np.int64))
            adj_list.append(np.array(new_adjs, dtype=np.int64).T)
        return sample_list, adj_list

    # host-side index remapping (mirrors HomoAttModel.transform)
    def transform(self, sample_list, adj_list):
        trans_adj_list, target_index_outs = [], []
        base = {int(k): v for v, k in enumerate(sample_list[0])}
        for i, adjs in enumerate(adj_list):
            target_index_outs.append([base[int(k)] for k in adjs[0]])
            base = {int(k): v for v, k in enumerate(sample_list[i + 1])}
            out_idx = [base[int(k)] for k in adjs[0]]
            in_idx = [base[int(k)] for k in adjs[1]]
            trans_adj_list.append([out_idx, in_idx])
        return target_index_outs, trans_adj_list

    def forward(self, feats, adj, samples, rng):
        sample_list, adj_list = self.sample(adj, samples, rng)
        target_index_outs, trans_adj_list = self.transform(sample_list, adj_list)

        n0 = len(sample_list[-1])
        x_np = np.zeros((_pad_to(n0, LANE), self.in0_pad), np.float32)
        x_np[:n0, :self.in_dim] = np.asarray(feats)[sample_list[-1]]
        x = jnp.asarray(x_np, jnp.bfloat16)

        for i in range(self.nlayer):
            adj_tr = trans_adj_list[-i - 1]
            tio = np.asarray(target_index_outs[-i - 1], np.int64)
            src_nb = np.asarray(adj_tr[0], np.int64)   # edge target, neighbor-space index
            dst_nb = np.asarray(adj_tr[1], np.int64)   # edge neighbor, neighbor-space index
            t_pad = _pad_to(len(sample_list[-i - 2]), LANE)
            n_pad = _pad_to(len(sample_list[-i - 1]), LANE)
            assert x.shape[0] == n_pad

            # per-target neighbor-space index (no dense one-hot gather matrix)
            src_idx = np.zeros((t_pad,), np.int32)
            src_idx[tio] = src_nb
            # int8 edge mask; the scatter of e onto (T, N) is expressed as mask-fill
            mask = np.zeros((t_pad, n_pad), np.int8)
            mask[tio, dst_nb] = 1

            nh, hdp = self.nheads[i], self.hdp[i]
            nh8 = _pad_to(nh, 8)
            h_proj, f1, f2 = project(x, self.w_aug[i], hdp)
            rowf1 = jnp.take(f1, jnp.asarray(src_idx), axis=0)   # (t_pad, 128) gather
            f2t = jnp.transpose(f2)[:nh8]                        # (nh8, n_pad), f2 per neighbor
            x = homo_att_layer(rowf1, f2t, h_proj, mask, nh, self.d, hdp, self.alpha)

        y = linear_tanh(x, self.lin_w, self.lin_b)
        return y[:len(samples), :self.lin_dim]


# ----------------------------- demo -----------------------------

if __name__ == "__main__":
    key = jax.random.PRNGKey(0)
    n_nodes, in_dim, out_dim = 24, 16, 8
    nheads, nlayer, neigh_por = [2, 2], 2, 0.5
    alpha, dropout = 0.2, 0.5

    # synthetic graph in the (flat neighbor array, per-node neighbor count) format
    np_rng = np.random.RandomState(0)
    counts = np_rng.randint(2, 5, size=n_nodes)
    flat = []
    for v in range(n_nodes):
        nb = np_rng.choice(np.delete(np.arange(n_nodes), v), size=counts[v], replace=False)
        flat.extend(int(u) for u in nb)
    adj = (np.array(flat, dtype=np.int64), np.array(counts, dtype=np.int64))
    samples = np.array([1, 5, 9, 13, 17, 21], dtype=np.int64)

    key, kfeat, kparam = jax.random.split(key, 3)
    feats = jax.random.normal(kfeat, (n_nodes, in_dim), jnp.float32)

    model = HomoAttModelPallas(kparam, in_dim, out_dim, dropout, alpha, nheads, nlayer, neigh_por)
    out = model.forward(np.asarray(feats), adj, samples, pyrandom.Random(0))
    out = jax.block_until_ready(out)

    assert out.shape == (len(samples), out_dim * nheads[-1]), out.shape
    assert bool(jnp.all(jnp.isfinite(out)))
    print("KERNEL_OK")
</pallas_src>

<mosaic_0001>
module attributes {stable_mosaic.version = 11 : i64} {
  func.func @_proj_kernel(%arg0: i32, %arg1: i32, %arg2: memref<64x128xbf16, #tpu.memory_space<vmem>>, %arg3: memref<128x384xbf16, #tpu.memory_space<vmem>>, %arg4: memref<64x128xbf16, #tpu.memory_space<vmem>>, %arg5: memref<64x128xf32, #tpu.memory_space<vmem>>, %arg6: memref<64x128xf32, #tpu.memory_space<vmem>>, %arg7: memref<64x384xf32, #tpu.memory_space<vmem>>) attributes {dimension_semantics = [#tpu.dimension_semantics<parallel>, #tpu.dimension_semantics<arbitrary>], iteration_bounds = array<i64: 2, 1>, scalar_prefetch = 0 : i64, scratch_operands = 1 : i64, tpu.core_type = #tpu.core_type<tc>, window_params = [{transform_indices = @transform_0, window_bounds = array<i64: 64, 128>}, {transform_indices = @transform_1, window_bounds = array<i64: 128, 384>}, {transform_indices = @transform_2, window_bounds = array<i64: 64, 128>}, {transform_indices = @transform_3, window_bounds = array<i64: 64, 128>}, {transform_indices = @transform_4, window_bounds = array<i64: 64, 128>}]} {
    %c0_i32 = arith.constant 0 : i32
    %0 = arith.cmpi eq, %arg1, %c0_i32 : i32
    %1 = arith.extui %0 : i1 to i32
    %c0_i32_0 = arith.constant 0 : i32
    %2 = arith.cmpi ne, %1, %c0_i32_0 : i32
    scf.if %2 {
      %cst_10 = arith.constant 0.000000e+00 : f32
      %12 = vector.broadcast %cst_10 : f32 to vector<64x384xf32>
      %c0_11 = arith.constant 0 : index
      %c0_12 = arith.constant 0 : index
      %13 = vector.load %arg7[%c0_11, %c0_12] : memref<64x384xf32, #tpu.memory_space<vmem>>, vector<64x384xf32>
      tpu.vector_store %arg7[%c0_11, %c0_12], %12 {strides = array<i32>} : memref<64x384xf32, #tpu.memory_space<vmem>>, vector<64x384xf32>,
    } else {
    }
    %c0 = arith.constant 0 : index
    %c0_1 = arith.constant 0 : index
    %3 = vector.load %arg7[%c0, %c0_1] : memref<64x384xf32, #tpu.memory_space<vmem>>, vector<64x384xf32>
    %c0_2 = arith.constant 0 : index
    %c0_3 = arith.constant 0 : index
    %4 = vector.load %arg2[%c0_2, %c0_3] : memref<64x128xbf16, #tpu.memory_space<vmem>>, vector<64x128xbf16>
    %c0_4 = arith.constant 0 : index
    %c0_5 = arith.constant 0 : index
    %5 = vector.load %arg3[%c0_4, %c0_5] : memref<128x384xbf16, #tpu.memory_space<vmem>>, vector<128x384xbf16>
    %cst = arith.constant dense<0.000000e+00> : vector<64x384xf32>
    %6 = tpu.matmul %4, %5, %cst {dimension_numbers = #tpu.dot_dimension_numbers<[1], [0], [0], [1], [0, 0, 1, 1], [], []>} : vector<64x128xbf16>, vector<128x384xbf16>, vector<64x384xf32> -> vector<64x384xf32>
    %7 = arith.addf %3, %6 : vector<64x384xf32>
    %c0_6 = arith.constant 0 : index
    %c0_7 = arith.constant 0 : index
    %8 = vector.load %arg7[%c0_6, %c0_7] : memref<64x384xf32, #tpu.memory_space<vmem>>, vector<64x384xf32>
    tpu.vector_store %arg7[%c0_6, %c0_7], %7 {strides = array<i32>} : memref<64x384xf32, #tpu.memory_space<vmem>>, vector<64x384xf32>,
    %c0_i32_8 = arith.constant 0 : i32
    %9 = arith.cmpi eq, %arg1, %c0_i32_8 : i32
    %10 = arith.extui %9 : i1 to i32
    %c0_i32_9 = arith.constant 0 : i32
    %11 = arith.cmpi ne, %10, %c0_i32_9 : i32
    scf.if %11 {
      %c0_10 = arith.constant 0 : index
      %c0_11 = arith.constant 0 : index
      %12 = vector.load %arg7[%c0_10, %c0_11] : memref<64x384xf32, #tpu.memory_space<vmem>>, vector<64x384xf32>
      %13 = vector.extract_strided_slice %12 {offsets = [0, 0], sizes = [64, 128], strides = [1, 1]} : vector<64x384xf32> to vector<64x128xf32>
      %14 = arith.truncf %13 : vector<64x128xf32> to vector<64x128xbf16>
      %c0_12 = arith.constant 0 : index
      %c0_13 = arith.constant 0 : index
      %15 = vector.load %arg4[%c0_12, %c0_13] : memref<64x128xbf16, #tpu.memory_space<vmem>>, vector<64x128xbf16>
      tpu.vector_store %arg4[%c0_12, %c0_13], %14 {strides = array<i32>} : memref<64x128xbf16, #tpu.memory_space<vmem>>, vector<64x128xbf16>,
      %16 = vector.extract_strided_slice %12 {offsets = [0, 128], sizes = [64, 128], strides = [1, 1]} : vector<64x384xf32> to vector<64x128xf32>
      %c0_14 = arith.constant 0 : index
      %c0_15 = arith.constant 0 : index
      %17 = vector.load %arg5[%c0_14, %c0_15] : memref<64x128xf32, #tpu.memory_space<vmem>>, vector<64x128xf32>
      tpu.vector_store %arg5[%c0_14, %c0_15], %16 {strides = array<i32>} : memref<64x128xf32, #tpu.memory_space<vmem>>, vector<64x128xf32>,
      %18 = vector.extract_strided_slice %12 {offsets = [0, 256], sizes = [64, 128], strides = [1, 1]} : vector<64x384xf32> to vector<64x128xf32>
      %c0_16 = arith.constant 0 : index
      %c0_17 = arith.constant 0 : index
      %19 = vector.load %arg6[%c0_16, %c0_17] : memref<64x128xf32, #tpu.memory_space<vmem>>, vector<64x128xf32>
      tpu.vector_store %arg6[%c0_16, %c0_17], %18 {strides = array<i32>} : memref<64x128xf32, #tpu.memory_space<vmem>>, vector<64x128xf32>,
    } else {
    }
    return
  }
  func.func @transform_0(%arg0: i32, %arg1: i32) -> (i32, i32) {
    %c0_i32 = arith.constant 0 : i32
    return %arg0, %arg1 : i32, i32
  }
  func.func @transform_1(%arg0: i32, %arg1: i32) -> (i32, i32) {
    %c0_i32 = arith.constant 0 : i32
    %c0_i32_0 = arith.constant 0 : i32
    return %arg1, %c0_i32 : i32, i32
  }
  func.func @transform_2(%arg0: i32, %arg1: i32) -> (i32, i32) {
    %c0_i32 = arith.constant 0 : i32
    %c0_i32_0 = arith.constant 0 : i32
    return %arg0, %c0_i32 : i32, i32
  }
  func.func @transform_3(%arg0: i32, %arg1: i32) -> (i32, i32) {
    %c0_i32 = arith.constant 0 : i32
    %c0_i32_0 = arith.constant 0 : i32
    return %arg0, %c0_i32 : i32, i32
  }
  func.func @transform_4(%arg0: i32, %arg1: i32) -> (i32, i32) {
    %c0_i32 = arith.constant 0 : i32
    %c0_i32_0 = arith.constant 0 : i32
    return %arg0, %c0_i32 : i32, i32
  }
}

</mosaic_0001>

<bundles_post_ra>
// kernel: tpu_custom_call.1
= control target key start
LH: loop header
LB: loop body
LE: loop exit
PB: predicated region body
PF: predicated region fallthrough
CT: control target
= control target key end

     0   :  { %s1840_s0 = inlined_call_operand.hbm [shape: bf16[128,128], index: 0, kind: input, shape index: {}]   ;;  %s1841_s1 = inlined_call_operand.hbm [shape: bf16[128,384], index: 1, kind: input, shape index: {}]   ;;  %s1842_s2 = inlined_call_operand.hbm [shape: bf16[128,128], index: 2, kind: output, shape index: {0}]   ;;  %s1843_s3 = inlined_call_operand.hbm [shape: f32[128,128], index: 3, kind: output, shape index: {1}]   ;;  %s1844_s4 = inlined_call_operand.hbm [shape: f32[128,128], index: 4, kind: output, shape index: {2}]  }
   0x1   :  { %1849 = sst [smem:[#allocation16_spill]] %s1840_s0 }
   0x2   :  { %1850 = sst [smem:[#allocation17_spill]] %s1841_s1 }
   0x3   :  { %10 = vsyncpa [#allocation4], 0 }
   0x4   :  { %12 = vsyncpa [#allocation4 + $0x1], 0 }
   0x5   :  { %13 = vsyncpa [#allocation7], 0 }
   0x6   :  { %14 = vsyncpa [#allocation5], 0 }
   0x7   :  { %16 = vsyncpa [#allocation5 + $0x1], 0 }
   0x8   :  { %17 = vsyncpa [#allocation10], 0 }
   0x9   :  { %19 = vsyncpa [#allocation10 + $0x1], 0  ;;  %s1509_s15 = smov 0   ;;  %s1511_s16 = smov 0  }
   0xa   :  { %s1513_s17 = smov 0   ;;  %s1515_s18 = smov 0  }
   0xb   :  { %s1517_s19 = smov 0   ;;  %s1519_s20 = smov 0  }
   0xc LB: > { %s1540_s21 = sadd.s32 4294967295, %s1468_s20   ;;  %s1848_s22 = sadd.s32 4294967294, %s1468_s20   ;;  %s1468_s20 = sphi %s1519_s20, %s25_s20   ;;  %s1464_s19 = sphi %s1517_s19, %s1872_s19   ;;  %s1460_s18 = sphi %s1515_s18, %s1871_s18   ;;  %s1456_s17 = sphi %s1513_s17, %s1870_s17   ;;  %s1452_s16 = sphi %s1511_s16, %s1869_s16   ;;  %s1448_s15 = sphi %s1509_s15, %s1868_s15  }
   0xd   : > { %p59_p0 = scmp.ne.s32.totalorder %s1452_s16, %s1448_s15  ;;  %p1845_p1 = scmp.eq.s32.totalorder %s1540_s21, 0 }
   0xe   : > { %p115_p3 = scmp.eq.s32.totalorder %s1848_s22, 1  ;;  %p1006_p5 = scmp.ge.s32.totalorder %s1468_s20, 1 }
   0xf   : > { %p1551_p4 = por %p1845_p1, %p59_p0  ;;  %p174_p7 = scmp.lt.s32.totalorder %s1468_s20, 3 }
  0x10   : > { %p1556_p6 = por %p115_p3, %p59_p0  ;;  %s1470_s26 = smov [#allocation6]  }
  0x11   : > { %s1851_s23 = scalar_select %p1551_p4, 1, 0 }
  0x12   : > { %s1852_s24 = scalar_select %p1556_p6, 1, 0 }
  0x13   : > { %p1561_p8 = pnand %p1006_p5, %p174_p7  ;;  %s190_s27 = sshll.u32 %s1470_s26, 4  ;;  %s191_s27 = int_to_ptr.vmem [resolvable:$true] %s190_s27 }
  0x14   : > { %s37_s29 = sadd.s32 1, %s1464_s19  ;;  %s1855_s1 = sld [smem:[#allocation17_spill]] }
  0x15   : > { %s1853_s25 = scalar_select %p1561_p8, 1, 0 }
  0x16   : > { %p1148_p9 = pneg %p1561_p8 }
  0x18   : > { %p1570_p11 = pnand %p1148_p9, %p1845_p1 }
  0x1a   : > { %s1264_s6 = scalar_lea.hbm %s1855_s1, 3072  ;;  %p1266_p13 = pneg %p1570_p11 }
  0x1b   : > { %p1265_p12 = scmp.ne.s32.totalorder %s1855_s1, %s1264_s6  ;;  %p1271_p5 = scmp.lt.u32.totalorder %s1264_s6, %s1855_s1 }
  0x1d   : > { %p1267_p0 = pnand %p1266_p13, %p1265_p12 }
  0x1f   : > { %p1268_p3 = pneg %p1267_p0 }
  0x21   : > { %p1273_p7 = pnand %p1271_p5, %p1268_p3 }
  0x23   : > { %1276 = shalt.err (!%p1273_p7)
}
  0x24   : > { %s1277_s11 = scalar_lea.vmem %s191_s27, 3072  ;;  %p1285_p2 = scmp.lt.s32.totalorder %s191_s27, %s191_s27 }
  0x25   : > { %p1278_p9 = scmp.ne.s32.totalorder %s191_s27, %s1277_s11  ;;  %p1286_p6 = scmp.lt.s32.totalorder %s1277_s11, %s1277_s11 }
  0x27   : > { %p1280_p10 = pnand %p1278_p9, %p1266_p13  ;;  %p1287_p4 = por %p1286_p6, %p1285_p2 }
  0x29   : > { %p1281_p1 = pneg %p1280_p10 }
  0x2b   : > { %p1288_p8 = pnand %p1287_p4, %p1281_p1 }
  0x2d   : > { %1291 = shalt.err (!%p1288_p8)
}
  0x2e   : > { %s1471_s12 = smov 192   ;;  %s1472_s13 = smov 12  }
  0x2f   : > { %1151 = dma.hbm_to_vmem [thread:$0]  (!%p1570_p11), %s1855_s1, 3072, %s191_s27, [#allocation7], %s1471_s12, %s1471_s12, %s1472_s13  }
  0x30   : > { %p39_p1 = scmp.ge.s32.totalorder %s37_s29, 2  ;;  %s46_s30 = sadd.s32 1, %s1456_s17 }
  0x31   : > { %p53_p2 = scmp.ne.s32.totalorder %s1456_s17, %s1452_s16  ;;  %p54_p4 = scmp.eq.s32.totalorder %s1468_s20, 0 }
  0x32   : > { %s1874_s29 = smov (%p39_p1, %s37_s29), 0  ;;  %p1857_p8 = scmp.eq.s32.totalorder %s1540_s21, 1 }
  0x33   : > { %p1597_p6 = por %p54_p4, %p53_p2  ;;  %s41_s28 = ssub.s32 %s1464_s19, %s1874_s29 }
  0x34   : > { %p1603_p10 = por %p1857_p8, %p53_p2  ;;  %p1167_p12 = scmp.lt.s32.totalorder %s1468_s20, 2 }
  0x35   : > { %p44_p11 = scmp.eq.s32.totalorder %s41_s28, 0  ;;  %s204_s27 = sand.u32 1, %s1456_s17  }
  0x36   : > { %s1009_s7 = sshll.u32 %s204_s27, 5  ;;  %s1065_s9 = sshll.u32 %s1464_s19, 9 }
  0x37   : > { %s1612_s8 = scalar_select %p44_p11, %s1456_s17, %s46_s30  }
  0x38   : > { %s1859_s0 = sld [smem:[#allocation16_spill]]  ;;  %s208_s13 = scalar_lea.vmem [#allocation3], %s1009_s7 }
  0x39   : > { %s216_s14 = sshll.u32 %s208_s13, 4  ;;  %p1624_p13 = pnand %p1167_p12, %p1597_p6  ;;  %s1620_s14 = int_to_ptr.vmem [resolvable:$true] %s216_s14 }
  0x3a   : > { %s1628_s30 = scalar_lea.sflag [#allocation4], %s204_s27 }
  0x3b   : > { %p1294_p3 = pneg %p1624_p13 }
  0x3e   : > { %s1618_s12 = scalar_lea.hbm %s1859_s0, %s1065_s9  ;;  %s1297_s5 = scalar_lea.hbm %s1859_s0, 1024 }
  0x3f   : > { %s1292_s28 = scalar_lea.hbm %s1618_s12, 512  ;;  %p1298_p9 = scmp.lt.u32.totalorder %s1618_s12, %s1859_s0 }
  0x40   : > { %p1293_p0 = scmp.ne.s32.totalorder %s1618_s12, %s1292_s28  ;;  %p1299_p1 = scmp.lt.u32.totalorder %s1297_s5, %s1292_s28 }
  0x41   : > { %p1301_p4 = scmp.lt.u32.totalorder %s1292_s28, %s1618_s12 }
  0x42   : > { %p1295_p5 = pnand %p1294_p3, %p1293_p0  ;;  %p1300_p2 = por %p1299_p1, %p1298_p9 }
  0x44   : > { %p1296_p7 = pneg %p1295_p5  ;;  %p1302_p6 = por %p1301_p4, %p1300_p2 }
  0x46   : > { %p1303_p8 = pnand %p1302_p6, %p1296_p7 }
  0x48   : > { %1306 = shalt.err (!%p1303_p8)
}
  0x49   : > { %s1307_s27 = scalar_lea.vmem %s1620_s14, 512  ;;  %s1473_s13 = smov [#allocation3]  }
  0x4a   : > { %p1308_p12 = scmp.ne.s32.totalorder %s1620_s14, %s1307_s27  ;;  %s1312_s7 = sshll.u32 %s1473_s13, 4  ;;  %s1313_s7 = int_to_ptr.vmem [resolvable:$false] %s1312_s7 }
  0x4b   : > { %s1314_s9 = scalar_lea.vmem %s1313_s7, 1024  ;;  %p1315_p5 = scmp.lt.s32.totalorder %s1620_s14, %s1313_s7 }
  0x4c   : > { %p1310_p11 = pnand %p1308_p12, %p1294_p3  ;;  %p1316_p9 = scmp.lt.s32.totalorder %s1314_s9, %s1307_s27 }
  0x4e   : > { %p1311_p0 = pneg %p1310_p11  ;;  %p1317_p1 = por %p1316_p9, %p1315_p5 }
  0x50   : > { %p1318_p2 = pnand %p1317_p1, %p1311_p0 }
  0x52   : > { %1321 = shalt.err (!%p1318_p2)
}
  0x53   : > { %s1474_s28 = smov 64   ;;  %s1475_s5 = smov 4  }
  0x54   : > { %1155 = dma.hbm_to_vmem [thread:$0]  (!%p1624_p13), %s1618_s12, 512, %s1620_s14, %s1628_s30, %s1474_s28, %s1474_s28, %s1475_s5  }
  0x55   : > { %p1861_p3 = scmp.ne.s32.totalorder %s1853_s25, 0 }
  0x56   : > { %s1659_s10 = sand.u32 (!%p1861_p3), 1, %s1452_s16   ;;  %p1862_p7 = scmp.ne.s32.totalorder (!%p1861_p3), %s1851_s23, 0 }
  0x57   : > { %228 = sbr.rel (%p1861_p3) target bundleno = 432 (0x1b0), region = 28  ;;  %s1013_s11 = sshll.u32 (!%p1861_p3), %s1659_s10, 5 }
  0x58   : > { %s231_s27 = scalar_lea.sflag (!%p1861_p3), [#allocation4], %s1659_s10  ;;  %s1665_s13 = scalar_lea.vmem (!%p1861_p3), [#allocation3], %s1013_s11 }
  0x5e   : > { %1431 = dma.done.wait (%p1862_p7), %s231_s27, 512  }
  0x5f   : > { %1433 = vsyncadd (%p1862_p7), %s231_s27, 4294966784  ;;  %p1863_p13 = scmp.eq.s32.totalorder %s1540_s21, 0 }
  0x61   : > { %1435 = dma.done.wait (%p1863_p13), [#allocation7], 3072   ;;  %p1864_p4 = pmov %p1863_p13 }
  0x62   : > { %v1476_v0 = vmov 0   ;;  %v1228_v1 = vld [vmem:[#allocation6 + $0x4] ss:$12 sps:$4 sm:$0xff]   ;;  %v1230_v2 = vld [vmem:[#allocation6] ss:$12 sps:$4 sm:$0xff]   ;;  %v1263_v28 = vld [vmem:[%s1665_s13 + $0x18] sm:$0xff]  }
  0x63   : > { %1437 = vsyncadd (%p1864_p4), [#allocation7], 4294964224  ;;  %555 = vmatprep.mubr.bf16.mxu0 %v1476_v0  ;;  %523 = vmatprep.subr.bf16.mxu0 %v1228_v1  ;;  %v1231_v3 = vld [vmem:[#allocation6 + $0x1c] ss:$12 sps:$4 sm:$0xff]   ;;  %v1233_v4 = vld [vmem:[#allocation6 + $0x18] ss:$12 sps:$4 sm:$0xff]  }
  0x64   : > { %524 = vmatpush1.bf16.msra.mxu0 %v1230_v2  ;;  %v1234_v5 = vld [vmem:[#allocation6 + $0x34] ss:$12 sps:$4 sm:$0xff]   ;;  %v1236_v7 = vld [vmem:[#allocation6 + $0x30] ss:$12 sps:$4 sm:$0xff]   ;;  %v1237_v8 = vld [vmem:[#allocation6 + $0x4c] ss:$12 sps:$4 sm:$0xff]  }
  0x65   : > { %525 = vmatprep.subr.bf16.mxu0 %v1231_v3  ;;  %v1240_v6 = vld [vmem:[#allocation6 + $0x8] ss:$12 sps:$4 sm:$0xff]   ;;  %v1244_v9 = vld [vmem:[#allocation6 + $0x20] ss:$12 sps:$4 sm:$0xff]   ;;  %v1248_v10 = vld [vmem:[#allocation6 + $0x38] ss:$12 sps:$4 sm:$0xff]  }
  0x66   : > { %1112 = vmatprep.subr.bf16.mxu1 %v1240_v6  ;;  %v1239_v11 = vld [vmem:[#allocation6 + $0x48] ss:$12 sps:$4 sm:$0xff]   ;;  %v1241_v12 = vld [vmem:[#allocation6 + $0x64] ss:$12 sps:$4 sm:$0xff]   ;;  %v1243_v13 = vld [vmem:[#allocation6 + $0x60] ss:$12 sps:$4 sm:$0xff]  }
  0x67   : > { %1113 = vmatpush3.bf16.msra.mxu1 %v1240_v6  ;;  %v1252_v14 = vld [vmem:[#allocation6 + $0x50] ss:$12 sps:$4 sm:$0xff]   ;;  %v1257_v16 = vld [vmem:[%s1665_s13] sm:$0xff]   ;;  %v1256_v17 = vld [vmem:[#allocation6 + $0x68] ss:$12 sps:$4 sm:$0xff]   ;;  %s1016_s23 = sshll.u32 %s1659_s10, 6 }
  0x68   : > { %526 = vmatpush1.bf16.msra.mxu0 %v1233_v4  ;;  %1114 = vmatprep.subr.bf16.mxu1 %v1244_v9  ;;  %v1245_v15 = vld [vmem:[#allocation6 + $0x7c] ss:$12 sps:$4 sm:$0xff]   ;;  %v1247_v18 = vld [vmem:[#allocation6 + $0x78] ss:$12 sps:$4 sm:$0xff]   ;;  %v1249_v19 = vld [vmem:[#allocation6 + $0x94] ss:$12 sps:$4 sm:$0xff]  }
  0x69   : > { %527 = vmatprep.subr.bf16.mxu0 %v1234_v5  ;;  %1128 = vmatprep.mubr.bf16.mxu1 %v1257_v16  ;;  %v1258_v20 = vld [vmem:[#allocation6 + $0x80] ss:$12 sps:$4 sm:$0xff]   ;;  %v1251_v21 = vld [vmem:[#allocation6 + $0x90] ss:$12 sps:$4 sm:$0xff]   ;;  %v1259_v23 = vld [vmem:[#allocation6 + $0x98] ss:$12 sps:$4 sm:$0xff]  }
  0x6a   : > { %v1253_v22 = vld [vmem:[#allocation6 + $0xac] ss:$12 sps:$4 sm:$0xff]   ;;  %v1255_v24 = vld [vmem:[#allocation6 + $0xa8] ss:$12 sps:$4 sm:$0xff]   ;;  %v1261_v25 = vld [vmem:[#allocation6 + $0xb0] ss:$12 sps:$4 sm:$0xff]  }
  0x6b   : > { %1115 = vmatpush3.bf16.msra.mxu1 %v1244_v9  ;;  %v1260_v26 = vld [vmem:[%s1665_s13 + $0x8] sm:$0xff]   ;;  %v1262_v27 = vld [vmem:[%s1665_s13 + $0x10] sm:$0xff]   ;;  %s1684_s25 = scalar_lea.vmem [#allocation9], %s1016_s23  ;;  %s1690_s12 = scalar_lea.vmem [#allocation8], %s1013_s11 }
  0x6c   : > { %528 = vmatpush1.bf16.msra.mxu0 %v1236_v7  ;;  %1116 = vmatprep.subr.bf16.mxu1 %v1248_v10  ;;  %s1693_s14 = scalar_lea.vmem [#allocation11], %s1016_s23  ;;  %s832_s26 = sshll.u32 %s1684_s25, 4  ;;  %s1713_s26 = int_to_ptr.vmem [resolvable:$true] %s832_s26 }
  0x6d   : > { %529 = vmatprep.subr.bf16.mxu0 %v1237_v8  ;;  %s816_s30 = sshll.u32 %s1690_s12, 4  ;;  %s797_s7 = sand.u32 1, %s1540_s21   ;;  %s1715_s30 = int_to_ptr.vmem [resolvable:$true] %s816_s30 }
  0x6e   : > { %s1075_s9 = sshll.u32 %s1460_s18, 10  ;;  %s848_s28 = sshll.u32 %s1693_s14, 4  ;;  %s1730_s28 = int_to_ptr.vmem [resolvable:$true] %s848_s28 }
  0x6f   : > { %1117 = vmatpush3.bf16.msra.mxu1 %v1248_v10  ;;  %s1721_s27 = scalar_lea.hbm %s1843_s3, %s1075_s9  ;;  %s1074_s13 = sshll.u32 %s1460_s18, 9 }
  0x70   : > { %530 = vmatpush1.bf16.msra.mxu0 %v1239_v11  ;;  %1118 = vmatprep.subr.bf16.mxu1 %v1252_v14  ;;  %s1728_s22 = scalar_lea.hbm %s1842_s2, %s1074_s13  ;;  %s1736_s11 = scalar_lea.hbm %s1844_s4, %s1075_s9 }
  0x71   : > { %531 = vmatprep.subr.bf16.mxu0 %v1241_v12  ;;  %s1739_s18 = scalar_lea.sflag [#allocation10], %s797_s7  ;;  %s1322_s0 = scalar_lea.vmem %s1713_s26, 1024 }
  0x72   : > { %p1323_p6 = scmp.ne.s32.totalorder %s1713_s26, %s1322_s0  ;;  %s1477_s1 = smov [#allocation9]  }
  0x73   : > { %1119 = vmatpush3.bf16.msra.mxu1 %v1252_v14  ;;  %s1326_s21 = sshll.u32 %s1477_s1, 4  ;;  %s1327_s21 = int_to_ptr.vmem [resolvable:$false] %s1326_s21 }
  0x74   : > { %532 = vmatpush1.bf16.msra.mxu0 %v1243_v13  ;;  %1120 = vmatprep.subr.bf16.mxu1 %v1256_v17  ;;  %p1324_p8 = pnand %p1323_p6, %p1603_p10  ;;  %s1328_s13 = scalar_lea.vmem %s1327_s21, 2048 }
  0x75   : > { %533 = vmatprep.subr.bf16.mxu0 %v1245_v15  ;;  %p1329_p11 = scmp.lt.s32.totalorder %s1713_s26, %s1327_s21  ;;  %p1330_p0 = scmp.lt.s32.totalorder %s1328_s13, %s1322_s0 }
  0x76   : > { %p1325_p12 = pneg %p1324_p8 }
  0x77   : > { %1121 = vmatpush3.bf16.msra.mxu1 %v1256_v17  ;;  %p1331_p5 = por %p1330_p0, %p1329_p11 }
  0x78   : > { %534 = vmatpush1.bf16.msra.mxu0 %v1247_v18  ;;  %1122 = vmatprep.subr.bf16.mxu1 %v1258_v20 }
  0x79   : > { %535 = vmatprep.subr.bf16.mxu0 %v1249_v19  ;;  %p1332_p9 = pnand %p1331_p5, %p1325_p12 }
  0x7b   : > { %1123 = vmatpush3.bf16.msra.mxu1 %v1258_v20 }
  0x7c   : > { %536 = vmatpush1.bf16.msra.mxu0 %v1251_v21  ;;  %1124 = vmatprep.subr.bf16.mxu1 %v1259_v23 }
  0x7d   : > { %537 = vmatprep.subr.bf16.mxu0 %v1253_v22 }
  0x7f   : > { %1125 = vmatpush3.bf16.msra.mxu1 %v1259_v23 }
  0x80   : > { %538 = vmatpush1.bf16.msra.mxu0 %v1255_v24  ;;  %1126 = vmatprep.subr.bf16.mxu1 %v1261_v25 }
  0x83   : > { %556 = vmatmul.mubr.bf16.vlgmr.msra.gmra.mrb[0].mxu0 %v1257_v16  ;;  %1127 = vmatpush3.bf16.msra.mxu1 %v1261_v25 }
  0x84   : > { %565 = vmatprep.mubr.bf16.mxu0 %v1476_v0 }
  0x86   : > { %1129 = vmatmul.mubr.bf16.vlgmr.msra.gmra.mrb[0].mxu1 %v1260_v26 }
  0x87   : > { %1132 = vmatprep.mubr.bf16.mxu1 %v1262_v27 }
  0x8b   : > { %566 = vmatmul.mubr.bf16.gmra.mrb[4].mxu0 %v1260_v26 }
  0x8c   : > { %575 = vmatprep.mubr.bf16.mxu0 %v1476_v0 }
  0x8e   : > { %1133 = vmatmul.mubr.bf16.gmra.mrb[4].mxu1 %v1263_v28 }
  0x93   : > { %576 = vmatmul.mubr.bf16.gmra.mrb[8].mxu0 %v1262_v27 }
  0x94   : > { %585 = vmatprep.mubr.bf16.mxu0 %v1476_v0 }
  0x9b   : > { %586 = vmatmul.mubr.bf16.gmra.mrb[12].mxu0 %v1263_v28 }
 0x156   : > { %v557_v29 = vpop.f32.mrb[0].mxu0 }
 0x157   : > { %v559_v30 = vpop.f32.mrb[1].mxu0 }
 0x158   : > { %776 = vst [vmem:[%s1684_s25] sm:$0xff] %v559_v30  ;;  %v561_v31 = vpop.f32.mrb[2].mxu0 }
 0x159   : > { %v1080_v32 = vpack.c.bf16 %v561_v31, %v557_v29  ;;  %v563_v33 = vpop.f32.mrb[3].mxu0  ;;  %v1130_v34 = vpop.f32.mrb[0].mxu1 }
 0x15a   : > { %777 = vst [vmem:[%s1684_s25 + $0x8] sm:$0xff] %v563_v33  ;;  %786 = vst [vmem:[%s1693_s14 + $0x10] sm:$0xff] %v1130_v34  ;;  %v630_v35 = vpop.f32.mrb[1].mxu1 }
 0x15b   : > { %1081 = vst [vmem:[%s1690_s12] sm:$0xff] %v1080_v32   ;;  %784 = vst [vmem:[%s1693_s14] sm:$0xff] %v630_v35  ;;  %v1131_v37 = vpop.f32.mrb[2].mxu1 }
 0x15c   : > { %787 = vst [vmem:[%s1693_s14 + $0x18] sm:$0xff] %v1131_v37  ;;  %v633_v39 = vpop.f32.mrb[3].mxu1 }
 0x15d   : > { %785 = vst [vmem:[%s1693_s14 + $0x8] sm:$0xff] %v633_v39 }
 0x15e   : > { %v567_v36 = vpop.f32.mrb[4].mxu0 }
 0x15f   : > { %v569_v38 = vpop.f32.mrb[5].mxu0 }
 0x160   : > { %778 = vst [vmem:[%s1684_s25 + $0x10] sm:$0xff] %v569_v38  ;;  %v571_v40 = vpop.f32.mrb[6].mxu0 }
 0x161   : > { %v1085_v41 = vpack.c.bf16 %v571_v40, %v567_v36  ;;  %v573_v42 = vpop.f32.mrb[7].mxu0  ;;  %v1134_v43 = vpop.f32.mrb[4].mxu1 }
 0x162   : > { %779 = vst [vmem:[%s1684_s25 + $0x18] sm:$0xff] %v573_v42  ;;  %790 = vst [vmem:[%s1693_s14 + $0x30] sm:$0xff] %v1134_v43  ;;  %v646_v44 = vpop.f32.mrb[5].mxu1 }
 0x163   : > { %1097 = vst [vmem:[%s1690_s12 + $0x8] sm:$0xff] %v1085_v41   ;;  %788 = vst [vmem:[%s1693_s14 + $0x20] sm:$0xff] %v646_v44  ;;  %v1135_v46 = vpop.f32.mrb[6].mxu1 }
 0x164   : > { %791 = vst [vmem:[%s1693_s14 + $0x38] sm:$0xff] %v1135_v46  ;;  %v649_v48 = vpop.f32.mrb[7].mxu1 }
 0x165   : > { %789 = vst [vmem:[%s1693_s14 + $0x28] sm:$0xff] %v649_v48 }
 0x166   : > { %v577_v45 = vpop.f32.mrb[8].mxu0 }
 0x167   : > { %v579_v47 = vpop.f32.mrb[9].mxu0 }
 0x168   : > { %780 = vst [vmem:[%s1684_s25 + $0x20] sm:$0xff] %v579_v47  ;;  %v581_v49 = vpop.f32.mrb[10].mxu0 }
 0x169   : > { %v1090_v50 = vpack.c.bf16 %v581_v49, %v577_v45  ;;  %v583_v51 = vpop.f32.mrb[11].mxu0 }
 0x16a   : > { %781 = vst [vmem:[%s1684_s25 + $0x28] sm:$0xff] %v583_v51 }
 0x16b   : > { %1098 = vst [vmem:[%s1690_s12 + $0x10] sm:$0xff] %v1090_v50  }
 0x16e   : > { %v587_v52 = vpop.f32.mrb[12].mxu0 }
 0x16f   : > { %v589_v53 = vpop.f32.mrb[13].mxu0 }
 0x170   : > { %782 = vst [vmem:[%s1684_s25 + $0x30] sm:$0xff] %v589_v53  ;;  %v591_v54 = vpop.f32.mrb[14].mxu0 }
 0x171   : > { %v1095_v55 = vpack.c.bf16 %v591_v54, %v587_v52  ;;  %v593_v56 = vpop.f32.mrb[15].mxu0 }
 0x172   : > { %783 = vst [vmem:[%s1684_s25 + $0x38] sm:$0xff] %v593_v56 }
 0x173   : > { %1099 = vst [vmem:[%s1690_s12 + $0x18] sm:$0xff] %v1095_v55  }
 0x174   : > { %1335 = shalt.err (!%p1332_p9)
}
 0x175   : > { %s1336_s25 = scalar_lea.hbm %s1721_s27, 1024  ;;  %s1340_s1 = scalar_lea.hbm %s1843_s3, 2048 }
 0x176   : > { %p1337_p1 = scmp.ne.s32.totalorder %s1721_s27, %s1336_s25  ;;  %p1341_p7 = scmp.lt.u32.totalorder %s1721_s27, %s1843_s3 }
 0x177   : > { %p1342_p13 = scmp.lt.u32.totalorder %s1340_s1, %s1336_s25  ;;  %p1344_p6 = scmp.lt.u32.totalorder %s1336_s25, %s1721_s27 }
 0x178   : > { %p1338_p2 = pnand %p1337_p1, %p1603_p10 }
 0x179   : > { %p1343_p4 = por %p1342_p13, %p1341_p7 }
 0x17a   : > { %p1339_p3 = pneg %p1338_p2 }
 0x17b   : > { %p1345_p8 = por %p1344_p6, %p1343_p4 }
 0x17d   : > { %p1346_p12 = pnand %p1345_p8, %p1339_p3 }
 0x17f   : > { %1349 = shalt.err (!%p1346_p12)
}
 0x180   : > { %s1478_s0 = smov 128   ;;  %s1479_s14 = smov 8  }
 0x181   : > { %1143 = dma.vmem_to_hbm [thread:$0]  (%p1603_p10), %s1713_s26, 1024, %s1721_s27, %s1739_s18, %s1478_s0, %s1478_s0, %s1479_s14  }
 0x182   : > { %s793_s5 = scalar_lea.sflag [#allocation5], %s1659_s10  ;;  %s1350_s21 = scalar_lea.vmem %s1715_s30, 512 }
 0x183   : > { %p1351_p11 = scmp.ne.s32.totalorder %s1715_s30, %s1350_s21  ;;  %s1480_s13 = smov [#allocation8]  }
 0x184   : > { %s1354_s25 = sshll.u32 %s1480_s13, 4  ;;  %s1355_s25 = int_to_ptr.vmem [resolvable:$false] %s1354_s25 }
 0x185   : > { %p1352_p0 = pnand %p1351_p11, %p1603_p10  ;;  %s1356_s12 = scalar_lea.vmem %s1355_s25, 1024 }
 0x186   : > { %p1357_p9 = scmp.lt.s32.totalorder %s1715_s30, %s1355_s25  ;;  %p1358_p1 = scmp.lt.s32.totalorder %s1356_s12, %s1350_s21 }
 0x187   : > { %p1353_p5 = pneg %p1352_p0 }
 0x188   : > { %p1359_p2 = por %p1358_p1, %p1357_p9 }
 0x18a   : > { %p1360_p3 = pnand %p1359_p2, %p1353_p5 }
 0x18c   : > { %1363 = shalt.err (!%p1360_p3)
}
 0x18d   : > { %s1364_s26 = scalar_lea.hbm %s1728_s22, 512  ;;  %s1368_s1 = scalar_lea.hbm %s1842_s2, 1024 }
 0x18e   : > { %p1365_p7 = scmp.ne.s32.totalorder %s1728_s22, %s1364_s26  ;;  %p1369_p6 = scmp.lt.u32.totalorder %s1728_s22, %s1842_s2 }
 0x18f   : > { %p1370_p8 = scmp.lt.u32.totalorder %s1368_s1, %s1364_s26  ;;  %p1372_p11 = scmp.lt.u32.totalorder %s1364_s26, %s1728_s22 }
 0x190   : > { %p1366_p13 = pnand %p1365_p7, %p1603_p10 }
 0x191   : > { %p1371_p12 = por %p1370_p8, %p1369_p6 }
 0x192   : > { %p1367_p4 = pneg %p1366_p13 }
 0x193   : > { %p1373_p0 = por %p1372_p11, %p1371_p12 }
 0x195   : > { %p1374_p5 = pnand %p1373_p0, %p1367_p4 }
 0x197   : > { %1377 = shalt.err (!%p1374_p5)
}
 0x198   : > { %s1481_s21 = smov 64   ;;  %s1482_s13 = smov 4  }
 0x199   : > { %1142 = dma.vmem_to_hbm [thread:$0]  (%p1603_p10), %s1715_s30, 512, %s1728_s22, %s793_s5, %s1481_s21, %s1481_s21, %s1482_s13  }
 0x19a   : > { %s1378_s25 = scalar_lea.vmem %s1730_s28, 1024  ;;  %s1483_s12 = smov [#allocation11]  }
 0x19b   : > { %p1379_p9 = scmp.ne.s32.totalorder %s1730_s28, %s1378_s25  ;;  %s1382_s26 = sshll.u32 %s1483_s12, 4  ;;  %s1383_s26 = int_to_ptr.vmem [resolvable:$false] %s1382_s26 }
 0x19c   : > { %s1384_s27 = scalar_lea.vmem %s1383_s26, 2048  ;;  %p1385_p3 = scmp.lt.s32.totalorder %s1730_s28, %s1383_s26 }
 0x19d   : > { %p1380_p1 = pnand %p1379_p9, %p1603_p10  ;;  %p1386_p7 = scmp.lt.s32.totalorder %s1384_s27, %s1378_s25 }
 0x19f   : > { %p1381_p2 = pneg %p1380_p1  ;;  %p1387_p13 = por %p1386_p7, %p1385_p3 }
 0x1a1   : > { %p1388_p4 = pnand %p1387_p13, %p1381_p2 }
 0x1a3   : > { %1391 = shalt.err (!%p1388_p4)
}
 0x1a4   : > { %s1392_s22 = scalar_lea.hbm %s1736_s11, 1024  ;;  %s1396_s5 = scalar_lea.hbm %s1844_s4, 2048 }
 0x1a5   : > { %p1393_p6 = scmp.ne.s32.totalorder %s1736_s11, %s1392_s22  ;;  %p1397_p11 = scmp.lt.u32.totalorder %s1736_s11, %s1844_s4 }
 0x1a6   : > { %p1398_p0 = scmp.lt.u32.totalorder %s1396_s5, %s1392_s22  ;;  %p1400_p9 = scmp.lt.u32.totalorder %s1392_s22, %s1736_s11 }
 0x1a7   : > { %p1394_p8 = pnand %p1393_p6, %p1603_p10 }
 0x1a8   : > { %p1399_p5 = por %p1398_p0, %p1397_p11 }
 0x1a9   : > { %p1395_p12 = pneg %p1394_p8 }
 0x1aa   : > { %p1401_p1 = por %p1400_p9, %p1399_p5 }
 0x1ac   : > { %p1402_p2 = pnand %p1401_p1, %p1395_p12 }
 0x1ae   : > { %1405 = shalt.err (!%p1402_p2)
}
 0x1af   : > { %1144 = dma.vmem_to_hbm [thread:$0]  (%p1603_p10), %s1730_s28, 1024, %s1736_s11, %s1739_s18, %s1478_s0, %s1478_s0, %s1479_s14  }
 0x1b0 PF: > { %s863_s9 = sand.u32 1, %s1448_s15   ;;  %p1865_p3 = scmp.ne.s32.totalorder %s1852_s24, 0 }
 0x1b1   : > { %p1866_p7 = scmp.ge.s32.totalorder %s1468_s20, 2  ;;  %s864_s23 = scalar_lea.sflag [#allocation5], %s863_s9 }
 0x1b3   : > { %p1157_p13 = pnand %p1866_p7, %p1865_p3 }
 0x1b5   : > { %1439 = dma.done.wait (!%p1157_p13), %s864_s23, 512  }
 0x1b6   : > { %1441 = vsyncadd (!%p1157_p13), %s864_s23, 4294966784  ;;  %s1867_s6 = sadd.s32 4294967294, %s1468_s20  }
 0x1b7   : > { %s872_s21 = sand.u32 1, %s1867_s6  }
 0x1b8   : > { %s873_s13 = scalar_lea.sflag [#allocation10], %s872_s21 }
 0x1b9   : > { %1443 = dma.done.wait (!%p1157_p13), %s873_s13, 2048  }
 0x1ba   : > { %1445 = vsyncadd (!%p1157_p13), %s873_s13, 4294965248  ;;  %s25_s20 = sadd.s32 1, %s1468_s20   ;;  %s1868_s15 = smov %s1452_s16 }
 0x1bb   : > { %p22_p10 = scmp.ge.s32.totalorder %s25_s20, 4   ;;  %s1869_s16 = smov %s1456_s17 }
 0x1bc   : > { %s1870_s17 = smov %s1612_s8  ;;  %s1871_s18 = smov %s1464_s19 }
 0x1bd   : > { %s1872_s19 = smov %s1874_s29  ;;  %24 = sbr.rel (!%p22_p10) target bundleno = 12 (0xc), region = 118 }
 0x1c4   :  { %887 = vsyncpa [#allocation4], 1 }
 0x1c5   :  { %889 = vsyncpa [#allocation4 + $0x1], 1 }
 0x1c6   :  { %890 = vsyncpa [#allocation7], 1 }
 0x1c7   :  { %891 = vsyncpa [#allocation5], 1 }
 0x1c8   :  { %893 = vsyncpa [#allocation5 + $0x1], 1 }
 0x1c9   :  { %894 = vsyncpa [#allocation10], 1 }
 0x1ca   :  { %896 = vsyncpa [#allocation10 + $0x1], 1 }

</bundles_post_ra>
